<compile_context>
chip_gen: v6e
topology: v6e:2x2x1
jax: 0.10.0
libtpu: 0.0.40
codegen_flags: <defaults>
</compile_context>

<pallas_src>
import functools

import jax
import jax.numpy as jnp
from jax.experimental import pallas as pl
from jax.experimental.pallas import tpu as pltpu

EPS = 1e-5  # PyTorch LayerNorm default


def _reverse_sigmoid(x):
    # forward value of the PyTorch reverse_sigmoid: clamp to [0.001, 0.999], then logit.
    # log(x) - log(1-x) avoids the divide (EUP-only chain on the (tn, 1) column).
    xc = jnp.clip(x, 0.001, 0.999)
    return jnp.log(xc) - jnp.log(1.0 - xc)


def mpu_gating_kernel(
    # row-tiled tensors
    unary_ref, pair_ref, aux_ref,
    # packed constant params (resident in VMEM across grid steps)
    ln_ref,          # (4, D)  : [gamma_u ; gamma_p ; beta_u ; beta_p] of LayerNorm(2D)
    lna_ref,         # (2, A)  : [gamma_a ; beta_a]                    of LayerNorm(A)
    w_u_ref,         # (D, Fc) : rows [:D]  of Linear(2D,F) weight, zero-padded to Fc=F+Fa
    w_p_ref,         # (D, Fc) : rows [D:]  of Linear(2D,F) weight, zero-padded
    wa_ref,          # (A, Fc) : Linear(A,Fa) weight placed in lanes [F:F+Fa]
    b_ref,           # (1, Fc) : [bias_F | bias_Fa]
    gw_ref,          # (1, 2)  : [gate_weight, aux_gate_weight]
    # outputs
    out_ref, gate_ref,
    *, filter_dim, aux_filter_dim,
):
    # relu in the input dtype (exact), widen to f32 only for stats / matmul
    ru = jnp.maximum(unary_ref[...], 0).astype(jnp.float32)
    rp = jnp.maximum(pair_ref[...], 0).astype(jnp.float32)
    aux = aux_ref[...].astype(jnp.float32)

    D = w_u_ref.shape[0]
    inv_2d = 1.0 / (2 * D)

    # ---- gate branch: LayerNorm over the *concatenated* row from the two halves ----
    mean = (jnp.sum(ru, axis=-1, keepdims=True)
            + jnp.sum(rp, axis=-1, keepdims=True)) * inv_2d
    du = ru - mean
    dp = rp - mean
    var = (jnp.sum(du * du, axis=-1, keepdims=True)
           + jnp.sum(dp * dp, axis=-1, keepdims=True)) * inv_2d
    inv_std = jax.lax.rsqrt(var + EPS)

    ln = ln_ref[...]
    hu = jnp.maximum(du * inv_std * ln[0:1, :] + ln[2:3, :], 0.0)
    hp = jnp.maximum(dp * inv_std * ln[1:2, :] + ln[3:4, :], 0.0)

    # ---- auxiliary branch: LayerNorm(A) -> relu ----
    amean = jnp.mean(aux, axis=-1, keepdims=True)
    ad = aux - amean
    avar = jnp.mean(ad * ad, axis=-1, keepdims=True)
    lna = lna_ref[...]
    ha = jnp.maximum(ad * jax.lax.rsqrt(avar + EPS) * lna[0:1, :] + lna[1:2, :], 0.0)

    # ---- fused Linear: [gate logits | aux logits] in one (tn, F+Fa) slab ----
    logits = (jnp.dot(hu, w_u_ref[...], preferred_element_type=jnp.float32)
              + jnp.dot(hp, w_p_ref[...], preferred_element_type=jnp.float32)
              + jnp.dot(ha, wa_ref[...], preferred_element_type=jnp.float32)
              + b_ref[...])
    sig = jax.nn.sigmoid(logits)                                      # one EUP pass, Fc<=128

    # masked lane means (iota+select; avoids unaligned lane slices)
    lane = jax.lax.broadcasted_iota(jnp.int32, sig.shape, dimension=1)
    gate = jnp.sum(jnp.where(lane < filter_dim, sig, 0.0),
                   axis=-1, keepdims=True) * (1.0 / filter_dim)        # [tn, 1]
    aux_gate = jnp.sum(jnp.where(lane >= filter_dim, sig, 0.0),
                       axis=-1, keepdims=True) * (1.0 / aux_filter_dim)  # [tn, 1]

    # ---- combine in logit space, re-squash, scale pair ----
    gv = gw_ref[...]
    g = jax.nn.sigmoid(gv[:, 0:1] * _reverse_sigmoid(gate)
                       + gv[:, 1:2] * _reverse_sigmoid(aux_gate))      # [tn, 1]

    # TODO(synk): use_auxiliary_gate_weight=True branch (gate *= auxiliary_gating_weight)
    # is not implemented; the module default is False.
    gate_ref[...] = g.astype(gate_ref.dtype)
    # re-read pair (VMEM, cheap) instead of keeping an early f32 cast live all kernel long
    out_ref[...] = (pair_ref[...].astype(jnp.float32) * g).astype(out_ref.dtype)


def _round_up(x, m):
    return ((x + m - 1) // m) * m


@functools.partial(jax.jit, static_argnames=("tile_n",))
def mpu_gating(unary, pair, aux, params, *, tile_n=2048):
    Nu, D = unary.shape
    Np, Dp = pair.shape
    assert Dp == D
    assert Nu == Np or Nu == 1 or Np == 1
    N = max(Nu, Np)
    Na, A = aux.shape
    assert Na == N

    # ---- pack / pad constant parameters (tiny; stays resident in VMEM) ----
    w_lin_w = params["w_lin_w"].astype(jnp.float32)          # (2D, F)
    wa_lin_w = params["wa_lin_w"].astype(jnp.float32)        # (A, Fa)
    F = w_lin_w.shape[1]
    Fa = wa_lin_w.shape[1]
    Fc = F + Fa

    w_u_pad = jnp.zeros((D, Fc), jnp.float32).at[:, :F].set(w_lin_w[:D])
    w_p_pad = jnp.zeros((D, Fc), jnp.float32).at[:, :F].set(w_lin_w[D:])
    wa_pad = jnp.zeros((A, Fc), jnp.float32).at[:, F:].set(wa_lin_w)
    b_pad = jnp.concatenate([params["w_lin_b"].reshape(1, F).astype(jnp.float32),
                             params["wa_lin_b"].reshape(1, Fa).astype(jnp.float32)], axis=1)
    ln_pack = jnp.concatenate([params["w_ln_g"][:, :D], params["w_ln_g"][:, D:],
                               params["w_ln_b"][:, :D], params["w_ln_b"][:, D:]],
                              axis=0).astype(jnp.float32)    # (4, D)
    lna_pack = jnp.concatenate([params["wa_ln_g"], params["wa_ln_b"]],
                               axis=0).astype(jnp.float32)   # (2, A)
    gw_pack = jnp.concatenate([params["gate_weight"].reshape(1, 1),
                               params["aux_gate_weight"].reshape(1, 1)],
                              axis=1).astype(jnp.float32)    # (1, 2)

    # ---- row tile: big enough to amortize per-step overhead, but keep >=4 grid
    # steps for large N so both v7x TensorCores get work; cdiv grid handles
    # remainders (out-of-bounds rows of partial tiles are dropped on write). ----
    if N == 1:
        tn = 1
    else:
        tn = min(tile_n, _round_up(pl.cdiv(N, 4), 8))
    grid = (pl.cdiv(N, tn),)

    def rows_spec(nrows, ncols):
        if nrows == 1 and N > 1:
            # broadcast-on-batch: single row stays resident, index pinned to block 0
            return pl.BlockSpec((1, ncols), lambda i: (0, 0))
        return pl.BlockSpec((tn, ncols), lambda i: (i, 0))

    def const_spec(arr):
        nd = arr.ndim
        return pl.BlockSpec(arr.shape, lambda i: (0,) * nd)

    in_specs = [
        rows_spec(Nu, D),                 # unary
        rows_spec(Np, D),                 # pair
        rows_spec(Na, A),                 # auxiliary
        const_spec(ln_pack), const_spec(lna_pack),
        const_spec(w_u_pad), const_spec(w_p_pad), const_spec(wa_pad), const_spec(b_pad),
        const_spec(gw_pack),
    ]
    out_specs = (
        pl.BlockSpec((tn, D), lambda i: (i, 0)),
        pl.BlockSpec((tn, 1), lambda i: (i, 0)),
    )

    itemsize = jnp.dtype(pair.dtype).itemsize
    flops = 2 * N * Fc * (2 * D + A)
    transcendentals = N * (Fc + 6)
    bytes_accessed = (itemsize * (Nu * D + Np * D + N * A + N * D) + 4 * N
                      + 4 * ((2 * D + A + 1) * Fc + 4 * D + 2 * A + 2))

    kernel = functools.partial(mpu_gating_kernel, filter_dim=F, aux_filter_dim=Fa)

    out, gate = pl.pallas_call(
        kernel,
        grid=grid,
        in_specs=in_specs,
        out_specs=out_specs,
        out_shape=(
            jax.ShapeDtypeStruct((N, D), pair.dtype),
            jax.ShapeDtypeStruct((N, 1), jnp.float32),
        ),
        compiler_params=pltpu.CompilerParams(
            dimension_semantics=("parallel",),          # megacore / 2-TC sharding on v7x
            vmem_limit_bytes=40 * 1024 * 1024,          # tn<=2048 fits; safe on v7x's 64 MiB
        ),
        cost_estimate=pl.CostEstimate(
            flops=int(flops),
            transcendentals=int(transcendentals),
            bytes_accessed=int(bytes_accessed),
        ),
    )(
        unary, pair, aux,
        ln_pack, lna_pack, w_u_pad, w_p_pad, wa_pad, b_pad, gw_pack,
    )
    return out, jnp.squeeze(gate, axis=-1)


def make_params(key, input_dim, auxiliary_dim, filter_dim=64):
    k = jax.random.split(key, 4)
    two_d = 2 * input_dim
    return {
        # self.w : LayerNorm(2*input_dim) -> ReLU -> Linear(2*input_dim, filter_dim)
        "w_ln_g": jnp.ones((1, two_d), jnp.float32),
        "w_ln_b": jnp.zeros((1, two_d), jnp.float32),
        "w_lin_w": jax.random.normal(k[0], (two_d, filter_dim), jnp.float32) * 0.05,
        "w_lin_b": jax.random.normal(k[1], (1, filter_dim), jnp.float32) * 0.05,
        # self.w_aux : LayerNorm(auxiliary_dim) -> ReLU -> Linear(auxiliary_dim, 8)
        "wa_ln_g": jnp.ones((1, auxiliary_dim), jnp.float32),
        "wa_ln_b": jnp.zeros((1, auxiliary_dim), jnp.float32),
        "wa_lin_w": jax.random.normal(k[2], (auxiliary_dim, 8), jnp.float32) * 0.05,
        "wa_lin_b": jax.random.normal(k[3], (1, 8), jnp.float32) * 0.05,
        # use_auxiliary_gate_weight=False -> both 0.5
        "gate_weight": jnp.array([0.5], jnp.float32),
        "aux_gate_weight": jnp.array([0.5], jnp.float32),
    }


def mpu_gating_ref(unary, pair, aux, p):
    """Pure-JAX reference mirroring the PyTorch forward (f32 math)."""
    if unary.shape[0] == 1 and pair.shape[0] > 1:
        unary = jnp.broadcast_to(unary, (pair.shape[0], unary.shape[1]))
    if unary.shape[0] > 1 and pair.shape[0] == 1:
        pair = jnp.broadcast_to(pair, (unary.shape[0], pair.shape[1]))
    unary = unary.astype(jnp.float32)
    pair = pair.astype(jnp.float32)
    aux = aux.astype(jnp.float32)

    def layernorm(x, g, b):
        m = jnp.mean(x, -1, keepdims=True)
        v = jnp.mean((x - m) ** 2, -1, keepdims=True)
        return (x - m) * jax.lax.rsqrt(v + EPS) * g + b

    def logit_clamped(x):
        xc = jnp.clip(x, 0.001, 0.999)
        return jnp.log(xc / (1.0 - xc))

    paired = jnp.maximum(jnp.concatenate([unary, pair], axis=1), 0.0)
    h = jnp.maximum(layernorm(paired, p["w_ln_g"], p["w_ln_b"]), 0.0)
    gate = jax.nn.sigmoid(h @ p["w_lin_w"] + p["w_lin_b"]).mean(axis=1)
    ha = jnp.maximum(layernorm(aux, p["wa_ln_g"], p["wa_ln_b"]), 0.0)
    aux_gate = jax.nn.sigmoid(ha @ p["wa_lin_w"] + p["wa_lin_b"]).mean(axis=1)
    g = jax.nn.sigmoid(p["gate_weight"][0] * logit_clamped(gate)
                       + p["aux_gate_weight"][0] * logit_clamped(aux_gate))
    return pair * g[:, None], g


if __name__ == "__main__":
    INPUT_DIM, AUX_DIM, FILTER_DIM = 128, 128, 64
    key = jax.random.PRNGKey(0)
    k_u, k_p, k_a, k_params = jax.random.split(key, 4)
    params = make_params(k_params, INPUT_DIM, AUX_DIM, FILTER_DIM)

    def check(unary, pair, aux, tile_n=2048, atol=1e-4, rtol=1e-4):
        out, gate = mpu_gating(unary, pair, aux, params, tile_n=tile_n)
        jax.block_until_ready((out, gate))
        out_ref, gate_ref = mpu_gating_ref(unary, pair, aux, params)
        assert out.shape == out_ref.shape and gate.shape == gate_ref.shape
        assert jnp.allclose(out.astype(jnp.float32), out_ref, atol=atol, rtol=rtol)
        assert jnp.allclose(gate, gate_ref, atol=atol, rtol=rtol)

    # 1) standard case
    N = 8
    unary = jax.random.normal(k_u, (N, INPUT_DIM), jnp.float32)
    pair = jax.random.normal(k_p, (N, INPUT_DIM), jnp.float32)
    aux = jax.random.normal(k_a, (N, AUX_DIM), jnp.float32)
    check(unary, pair, aux)

    # 2) broadcast-on-batch paths (handled via pinned index_map, no HBM broadcast)
    check(unary[:1], pair, aux)
    check(unary, pair[:1], aux)
    check(unary[:1], pair[:1], aux[:1])

    # 3) multi-step pipelined grid and a partial last tile
    N2 = 48
    unary2 = jax.random.normal(k_u, (N2, INPUT_DIM), jnp.float32)
    pair2 = jax.random.normal(k_p, (N2, INPUT_DIM), jnp.float32)
    aux2 = jax.random.normal(k_a, (N2, AUX_DIM), jnp.float32)
    check(unary2, pair2, aux2)                                 # grid = 4 (tn from cdiv(N,4))
    check(unary2[:44], pair2[:44], aux2[:44])                  # partial tail tile
    check(unary2[:20], pair2[:20], aux2[:20], tile_n=8)        # explicit small tile, grid = 3

    # 4) bf16 inputs (halves HBM traffic); internal math stays in f32
    check(unary.astype(jnp.bfloat16), pair.astype(jnp.bfloat16),
          aux.astype(jnp.bfloat16), atol=5e-2, rtol=2e-2)

    print("KERNEL_OK")
</pallas_src>

<mosaic_0001>
module attributes {stable_mosaic.version = 11 : i64} {
  func.func @mpu_gating_kernel(%arg0: i32, %arg1: memref<8x128xf32, #tpu.memory_space<vmem>>, %arg2: memref<8x128xf32, #tpu.memory_space<vmem>>, %arg3: memref<8x128xf32, #tpu.memory_space<vmem>>, %arg4: memref<4x128xf32, #tpu.memory_space<vmem>>, %arg5: memref<2x128xf32, #tpu.memory_space<vmem>>, %arg6: memref<128x72xf32, #tpu.memory_space<vmem>>, %arg7: memref<128x72xf32, #tpu.memory_space<vmem>>, %arg8: memref<128x72xf32, #tpu.memory_space<vmem>>, %arg9: memref<1x72xf32, #tpu.memory_space<vmem>>, %arg10: memref<1x2xf32, #tpu.memory_space<vmem>>, %arg11: memref<8x128xf32, #tpu.memory_space<vmem>>, %arg12: memref<8x1xf32, #tpu.memory_space<vmem>>) attributes {dimension_semantics = [#tpu.dimension_semantics<parallel>], iteration_bounds = array<i64: 1>, scalar_prefetch = 0 : i64, scratch_operands = 0 : i64, tpu.core_type = #tpu.core_type<tc>, window_params = [{transform_indices = @transform_0, window_bounds = array<i64: 8, 128>}, {transform_indices = @transform_1, window_bounds = array<i64: 8, 128>}, {transform_indices = @transform_2, window_bounds = array<i64: 8, 128>}, {pipeline_mode = #tpu.pipeline_mode<synchronous>, transform_indices = @transform_3, window_bounds = array<i64: 4, 128>}, {pipeline_mode = #tpu.pipeline_mode<synchronous>, transform_indices = @transform_4, window_bounds = array<i64: 2, 128>}, {pipeline_mode = #tpu.pipeline_mode<synchronous>, transform_indices = @transform_5, window_bounds = array<i64: 128, 72>}, {pipeline_mode = #tpu.pipeline_mode<synchronous>, transform_indices = @transform_6, window_bounds = array<i64: 128, 72>}, {pipeline_mode = #tpu.pipeline_mode<synchronous>, transform_indices = @transform_7, window_bounds = array<i64: 128, 72>}, {pipeline_mode = #tpu.pipeline_mode<synchronous>, transform_indices = @transform_8, window_bounds = array<i64: 1, 72>}, {pipeline_mode = #tpu.pipeline_mode<synchronous>, transform_indices = @transform_9, window_bounds = array<i64: 1, 2>}, {transform_indices = @transform_10, window_bounds = array<i64: 8, 128>}, {transform_indices = @transform_11, window_bounds = array<i64: 8, 1>}]} {
    %c0 = arith.constant 0 : index
    %c0_0 = arith.constant 0 : index
    %0 = vector.load %arg1[%c0, %c0_0] : memref<8x128xf32, #tpu.memory_space<vmem>>, vector<8x128xf32>
    %cst = arith.constant 0.000000e+00 : f32
    %1 = vector.broadcast %cst : f32 to vector<8x128xf32>
    %2 = arith.maximumf %0, %1 : vector<8x128xf32>
    %c0_1 = arith.constant 0 : index
    %c0_2 = arith.constant 0 : index
    %3 = vector.load %arg2[%c0_1, %c0_2] : memref<8x128xf32, #tpu.memory_space<vmem>>, vector<8x128xf32>
    %cst_3 = arith.constant 0.000000e+00 : f32
    %4 = vector.broadcast %cst_3 : f32 to vector<8x128xf32>
    %5 = arith.maximumf %3, %4 : vector<8x128xf32>
    %c0_4 = arith.constant 0 : index
    %c0_5 = arith.constant 0 : index
    %6 = vector.load %arg3[%c0_4, %c0_5] : memref<8x128xf32, #tpu.memory_space<vmem>>, vector<8x128xf32>
    %cst_6 = arith.constant dense<0.000000e+00> : vector<8xf32>
    %7 = vector.multi_reduction <add>, %2, %cst_6 [1] : vector<8x128xf32> to vector<8xf32>
    %8 = vector.shape_cast %7 : vector<8xf32> to vector<8x1xf32>
    %cst_7 = arith.constant dense<0.000000e+00> : vector<8xf32>
    %9 = vector.multi_reduction <add>, %5, %cst_7 [1] : vector<8x128xf32> to vector<8xf32>
    %10 = vector.shape_cast %9 : vector<8xf32> to vector<8x1xf32>
    %11 = arith.addf %8, %10 : vector<8x1xf32>
    %cst_8 = arith.constant 3.906250e-03 : f32
    %12 = vector.broadcast %cst_8 : f32 to vector<8x1xf32>
    %13 = arith.mulf %11, %12 : vector<8x1xf32>
    %14 = vector.broadcast %13 : vector<8x1xf32> to vector<8x128xf32>
    %15 = arith.subf %2, %14 : vector<8x128xf32>
    %16 = vector.broadcast %13 : vector<8x1xf32> to vector<8x128xf32>
    %17 = arith.subf %5, %16 : vector<8x128xf32>
    %18 = arith.mulf %15, %15 : vector<8x128xf32>
    %cst_9 = arith.constant dense<0.000000e+00> : vector<8xf32>
    %19 = vector.multi_reduction <add>, %18, %cst_9 [1] : vector<8x128xf32> to vector<8xf32>
    %20 = vector.shape_cast %19 : vector<8xf32> to vector<8x1xf32>
    %21 = arith.mulf %17, %17 : vector<8x128xf32>
    %cst_10 = arith.constant dense<0.000000e+00> : vector<8xf32>
    %22 = vector.multi_reduction <add>, %21, %cst_10 [1] : vector<8x128xf32> to vector<8xf32>
    %23 = vector.shape_cast %22 : vector<8xf32> to vector<8x1xf32>
    %24 = arith.addf %20, %23 : vector<8x1xf32>
    %cst_11 = arith.constant 3.906250e-03 : f32
    %25 = vector.broadcast %cst_11 : f32 to vector<8x1xf32>
    %26 = arith.mulf %24, %25 : vector<8x1xf32>
    %cst_12 = arith.constant 9.99999974E-6 : f32
    %27 = vector.broadcast %cst_12 : f32 to vector<8x1xf32>
    %28 = arith.addf %26, %27 : vector<8x1xf32>
    %29 = math.rsqrt %28 : vector<8x1xf32>
    %c0_13 = arith.constant 0 : index
    %c0_14 = arith.constant 0 : index
    %30 = vector.load %arg4[%c0_13, %c0_14] : memref<4x128xf32, #tpu.memory_space<vmem>>, vector<4x128xf32>
    %31 = vector.broadcast %29 : vector<8x1xf32> to vector<8x128xf32>
    %32 = arith.mulf %15, %31 : vector<8x128xf32>
    %33 = vector.extract_strided_slice %30 {offsets = [0, 0], sizes = [1, 128], strides = [1, 1]} : vector<4x128xf32> to vector<1x128xf32>
    %34 = vector.broadcast %33 : vector<1x128xf32> to vector<8x128xf32>
    %35 = arith.mulf %32, %34 : vector<8x128xf32>
    %36 = vector.extract_strided_slice %30 {offsets = [2, 0], sizes = [1, 128], strides = [1, 1]} : vector<4x128xf32> to vector<1x128xf32>
    %37 = vector.broadcast %36 : vector<1x128xf32> to vector<8x128xf32>
    %38 = arith.addf %35, %37 : vector<8x128xf32>
    %cst_15 = arith.constant 0.000000e+00 : f32
    %39 = vector.broadcast %cst_15 : f32 to vector<8x128xf32>
    %40 = arith.maximumf %38, %39 : vector<8x128xf32>
    %41 = vector.broadcast %29 : vector<8x1xf32> to vector<8x128xf32>
    %42 = arith.mulf %17, %41 : vector<8x128xf32>
    %43 = vector.extract_strided_slice %30 {offsets = [1, 0], sizes = [1, 128], strides = [1, 1]} : vector<4x128xf32> to vector<1x128xf32>
    %44 = vector.broadcast %43 : vector<1x128xf32> to vector<8x128xf32>
    %45 = arith.mulf %42, %44 : vector<8x128xf32>
    %46 = vector.extract_strided_slice %30 {offsets = [3, 0], sizes = [1, 128], strides = [1, 1]} : vector<4x128xf32> to vector<1x128xf32>
    %47 = vector.broadcast %46 : vector<1x128xf32> to vector<8x128xf32>
    %48 = arith.addf %45, %47 : vector<8x128xf32>
    %cst_16 = arith.constant 0.000000e+00 : f32
    %49 = vector.broadcast %cst_16 : f32 to vector<8x128xf32>
    %50 = arith.maximumf %48, %49 : vector<8x128xf32>
    %cst_17 = arith.constant dense<0.000000e+00> : vector<8xf32>
    %51 = vector.multi_reduction <add>, %6, %cst_17 [1] : vector<8x128xf32> to vector<8xf32>
    %52 = vector.shape_cast %51 : vector<8xf32> to vector<8x1xf32>
    %cst_18 = arith.constant 1.280000e+02 : f32
    %53 = vector.broadcast %cst_18 : f32 to vector<8x1xf32>
    %54 = arith.divf %52, %53 : vector<8x1xf32>
    %55 = vector.broadcast %54 : vector<8x1xf32> to vector<8x128xf32>
    %56 = arith.subf %6, %55 : vector<8x128xf32>
    %57 = arith.mulf %56, %56 : vector<8x128xf32>
    %cst_19 = arith.constant dense<0.000000e+00> : vector<8xf32>
    %58 = vector.multi_reduction <add>, %57, %cst_19 [1] : vector<8x128xf32> to vector<8xf32>
    %59 = vector.shape_cast %58 : vector<8xf32> to vector<8x1xf32>
    %cst_20 = arith.constant 1.280000e+02 : f32
    %60 = vector.broadcast %cst_20 : f32 to vector<8x1xf32>
    %61 = arith.divf %59, %60 : vector<8x1xf32>
    %c0_21 = arith.constant 0 : index
    %c0_22 = arith.constant 0 : index
    %62 = vector.load %arg5[%c0_21, %c0_22] : memref<2x128xf32, #tpu.memory_space<vmem>>, vector<2x128xf32>
    %cst_23 = arith.constant 9.99999974E-6 : f32
    %63 = vector.broadcast %cst_23 : f32 to vector<8x1xf32>
    %64 = arith.addf %61, %63 : vector<8x1xf32>
    %65 = math.rsqrt %64 : vector<8x1xf32>
    %66 = vector.broadcast %65 : vector<8x1xf32> to vector<8x128xf32>
    %67 = arith.mulf %56, %66 : vector<8x128xf32>
    %68 = vector.extract_strided_slice %62 {offsets = [0, 0], sizes = [1, 128], strides = [1, 1]} : vector<2x128xf32> to vector<1x128xf32>
    %69 = vector.broadcast %68 : vector<1x128xf32> to vector<8x128xf32>
    %70 = arith.mulf %67, %69 : vector<8x128xf32>
    %71 = vector.extract_strided_slice %62 {offsets = [1, 0], sizes = [1, 128], strides = [1, 1]} : vector<2x128xf32> to vector<1x128xf32>
    %72 = vector.broadcast %71 : vector<1x128xf32> to vector<8x128xf32>
    %73 = arith.addf %70, %72 : vector<8x128xf32>
    %cst_24 = arith.constant 0.000000e+00 : f32
    %74 = vector.broadcast %cst_24 : f32 to vector<8x128xf32>
    %75 = arith.maximumf %73, %74 : vector<8x128xf32>
    %c0_25 = arith.constant 0 : index
    %c0_26 = arith.constant 0 : index
    %76 = vector.load %arg6[%c0_25, %c0_26] : memref<128x72xf32, #tpu.memory_space<vmem>>, vector<128x72xf32>
    %cst_27 = arith.constant dense<0.000000e+00> : vector<8x72xf32>
    %77 = tpu.matmul %40, %76, %cst_27 {dimension_numbers = #tpu.dot_dimension_numbers<[1], [0], [0], [1], [0, 0, 1, 1], [], []>} : vector<8x128xf32>, vector<128x72xf32>, vector<8x72xf32> -> vector<8x72xf32>
    %c0_28 = arith.constant 0 : index
    %c0_29 = arith.constant 0 : index
    %78 = vector.load %arg7[%c0_28, %c0_29] : memref<128x72xf32, #tpu.memory_space<vmem>>, vector<128x72xf32>
    %cst_30 = arith.constant dense<0.000000e+00> : vector<8x72xf32>
    %79 = tpu.matmul %50, %78, %cst_30 {dimension_numbers = #tpu.dot_dimension_numbers<[1], [0], [0], [1], [0, 0, 1, 1], [], []>} : vector<8x128xf32>, vector<128x72xf32>, vector<8x72xf32> -> vector<8x72xf32>
    %80 = arith.addf %77, %79 : vector<8x72xf32>
    %c0_31 = arith.constant 0 : index
    %c0_32 = arith.constant 0 : index
    %81 = vector.load %arg8[%c0_31, %c0_32] : memref<128x72xf32, #tpu.memory_space<vmem>>, vector<128x72xf32>
    %cst_33 = arith.constant dense<0.000000e+00> : vector<8x72xf32>
    %82 = tpu.matmul %75, %81, %cst_33 {dimension_numbers = #tpu.dot_dimension_numbers<[1], [0], [0], [1], [0, 0, 1, 1], [], []>} : vector<8x128xf32>, vector<128x72xf32>, vector<8x72xf32> -> vector<8x72xf32>
    %83 = arith.addf %80, %82 : vector<8x72xf32>
    %c0_34 = arith.constant 0 : index
    %c0_35 = arith.constant 0 : index
    %84 = vector.load %arg9[%c0_34, %c0_35] : memref<1x72xf32, #tpu.memory_space<vmem>>, vector<1x72xf32>
    %85 = vector.broadcast %84 : vector<1x72xf32> to vector<8x72xf32>
    %86 = arith.addf %83, %85 : vector<8x72xf32>
    %87 = arith.negf %86 : vector<8x72xf32>
    %88 = math.exp %87 : vector<8x72xf32>
    %cst_36 = arith.constant 1.000000e+00 : f32
    %89 = vector.broadcast %cst_36 : f32 to vector<8x72xf32>
    %90 = arith.addf %89, %88 : vector<8x72xf32>
    %91 = arith.divf %89, %90 : vector<8x72xf32>
    %92 = tpu.iota {dimensions = array<i32: 1>} : vector<8x72xi32>
    %c64_i32 = arith.constant 64 : i32
    %93 = vector.broadcast %c64_i32 : i32 to vector<8x72xi32>
    %94 = arith.cmpi slt, %92, %93 : vector<8x72xi32>
    %cst_37 = arith.constant 0.000000e+00 : f32
    %95 = vector.broadcast %cst_37 : f32 to vector<8x72xf32>
    %96 = arith.select %94, %91, %95 : vector<8x72xi1>, vector<8x72xf32>
    %cst_38 = arith.constant dense<0.000000e+00> : vector<8xf32>
    %97 = vector.multi_reduction <add>, %96, %cst_38 [1] : vector<8x72xf32> to vector<8xf32>
    %98 = vector.shape_cast %97 : vector<8xf32> to vector<8x1xf32>
    %cst_39 = arith.constant 1.562500e-02 : f32
    %99 = vector.broadcast %cst_39 : f32 to vector<8x1xf32>
    %100 = arith.mulf %98, %99 : vector<8x1xf32>
    %c64_i32_40 = arith.constant 64 : i32
    %101 = vector.broadcast %c64_i32_40 : i32 to vector<8x72xi32>
    %102 = arith.cmpi sge, %92, %101 : vector<8x72xi32>
    %cst_41 = arith.constant 0.000000e+00 : f32
    %103 = vector.broadcast %cst_41 : f32 to vector<8x72xf32>
    %104 = arith.select %102, %91, %103 : vector<8x72xi1>, vector<8x72xf32>
    %cst_42 = arith.constant dense<0.000000e+00> : vector<8xf32>
    %105 = vector.multi_reduction <add>, %104, %cst_42 [1] : vector<8x72xf32> to vector<8xf32>
    %106 = vector.shape_cast %105 : vector<8xf32> to vector<8x1xf32>
    %cst_43 = arith.constant 1.250000e-01 : f32
    %107 = vector.broadcast %cst_43 : f32 to vector<8x1xf32>
    %108 = arith.mulf %106, %107 : vector<8x1xf32>
    %c0_44 = arith.constant 0 : index
    %c0_45 = arith.constant 0 : index
    %109 = vector.load %arg10[%c0_44, %c0_45] : memref<1x2xf32, #tpu.memory_space<vmem>>, vector<1x2xf32>
    %110 = vector.extract_strided_slice %109 {offsets = [0, 0], sizes = [1, 1], strides = [1, 1]} : vector<1x2xf32> to vector<1x1xf32>
    %cst_46 = arith.constant 1.000000e-03 : f32
    %cst_47 = arith.constant 9.990000e-01 : f32
    %111 = vector.broadcast %cst_46 : f32 to vector<8x1xf32>
    %112 = arith.maximumf %111, %100 : vector<8x1xf32>
    %113 = vector.broadcast %cst_47 : f32 to vector<8x1xf32>
    %114 = arith.minimumf %113, %112 : vector<8x1xf32>
    %115 = math.log %114 : vector<8x1xf32>
    %cst_48 = arith.constant 1.000000e+00 : f32
    %116 = vector.broadcast %cst_48 : f32 to vector<8x1xf32>
    %117 = arith.subf %116, %114 : vector<8x1xf32>
    %118 = math.log %117 : vector<8x1xf32>
    %119 = arith.subf %115, %118 : vector<8x1xf32>
    %120 = vector.broadcast %110 : vector<1x1xf32> to vector<8x1xf32>
    %121 = arith.mulf %120, %119 : vector<8x1xf32>
    %122 = vector.extract_strided_slice %109 {offsets = [0, 1], sizes = [1, 1], strides = [1, 1]} : vector<1x2xf32> to vector<1x1xf32>
    %cst_49 = arith.constant 1.000000e-03 : f32
    %cst_50 = arith.constant 9.990000e-01 : f32
    %123 = vector.broadcast %cst_49 : f32 to vector<8x1xf32>
    %124 = arith.maximumf %123, %108 : vector<8x1xf32>
    %125 = vector.broadcast %cst_50 : f32 to vector<8x1xf32>
    %126 = arith.minimumf %125, %124 : vector<8x1xf32>
    %127 = math.log %126 : vector<8x1xf32>
    %cst_51 = arith.constant 1.000000e+00 : f32
    %128 = vector.broadcast %cst_51 : f32 to vector<8x1xf32>
    %129 = arith.subf %128, %126 : vector<8x1xf32>
    %130 = math.log %129 : vector<8x1xf32>
    %131 = arith.subf %127, %130 : vector<8x1xf32>
    %132 = vector.broadcast %122 : vector<1x1xf32> to vector<8x1xf32>
    %133 = arith.mulf %132, %131 : vector<8x1xf32>
    %134 = arith.addf %121, %133 : vector<8x1xf32>
    %135 = arith.negf %134 : vector<8x1xf32>
    %136 = math.exp %135 : vector<8x1xf32>
    %cst_52 = arith.constant 1.000000e+00 : f32
    %137 = vector.broadcast %cst_52 : f32 to vector<8x1xf32>
    %138 = arith.addf %137, %136 : vector<8x1xf32>
    %139 = arith.divf %137, %138 : vector<8x1xf32>
    %c0_53 = arith.constant 0 : index
    %c0_54 = arith.constant 0 : index
    %140 = vector.load %arg12[%c0_53, %c0_54] : memref<8x1xf32, #tpu.memory_space<vmem>>, vector<8x1xf32>
    tpu.vector_store %arg12[%c0_53, %c0_54], %139 {strides = array<i32>} : memref<8x1xf32, #tpu.memory_space<vmem>>, vector<8x1xf32>,
    %c0_55 = arith.constant 0 : index
    %c0_56 = arith.constant 0 : index
    %141 = vector.load %arg2[%c0_55, %c0_56] : memref<8x128xf32, #tpu.memory_space<vmem>>, vector<8x128xf32>
    %142 = vector.broadcast %139 : vector<8x1xf32> to vector<8x128xf32>
    %143 = arith.mulf %141, %142 : vector<8x128xf32>
    %c0_57 = arith.constant 0 : index
    %c0_58 = arith.constant 0 : index
    %144 = vector.load %arg11[%c0_57, %c0_58] : memref<8x128xf32, #tpu.memory_space<vmem>>, vector<8x128xf32>
    tpu.vector_store %arg11[%c0_57, %c0_58], %143 {strides = array<i32>} : memref<8x128xf32, #tpu.memory_space<vmem>>, vector<8x128xf32>,
    return
  }
  func.func @transform_0(%arg0: i32) -> (i32, i32) {
    %c0_i32 = arith.constant 0 : i32
    %c0_i32_0 = arith.constant 0 : i32
    return %arg0, %c0_i32 : i32, i32
  }
  func.func @transform_1(%arg0: i32) -> (i32, i32) {
    %c0_i32 = arith.constant 0 : i32
    %c0_i32_0 = arith.constant 0 : i32
    return %arg0, %c0_i32 : i32, i32
  }
  func.func @transform_2(%arg0: i32) -> (i32, i32) {
    %c0_i32 = arith.constant 0 : i32
    %c0_i32_0 = arith.constant 0 : i32
    return %arg0, %c0_i32 : i32, i32
  }
  func.func @transform_3(%arg0: i32) -> (i32, i32) {
    %c0_i32 = arith.constant 0 : i32
    %c0_i32_0 = arith.constant 0 : i32
    %c0_i32_1 = arith.constant 0 : i32
    return %c0_i32, %c0_i32_0 : i32, i32
  }
  func.func @transform_4(%arg0: i32) -> (i32, i32) {
    %c0_i32 = arith.constant 0 : i32
    %c0_i32_0 = arith.constant 0 : i32
    %c0_i32_1 = arith.constant 0 : i32
    return %c0_i32, %c0_i32_0 : i32, i32
  }
  func.func @transform_5(%arg0: i32) -> (i32, i32) {
    %c0_i32 = arith.constant 0 : i32
    %c0_i32_0 = arith.constant 0 : i32
    %c0_i32_1 = arith.constant 0 : i32
    return %c0_i32, %c0_i32_0 : i32, i32
  }
  func.func @transform_6(%arg0: i32) -> (i32, i32) {
    %c0_i32 = arith.constant 0 : i32
    %c0_i32_0 = arith.constant 0 : i32
    %c0_i32_1 = arith.constant 0 : i32
    return %c0_i32, %c0_i32_0 : i32, i32
  }
  func.func @transform_7(%arg0: i32) -> (i32, i32) {
    %c0_i32 = arith.constant 0 : i32
    %c0_i32_0 = arith.constant 0 : i32
    %c0_i32_1 = arith.constant 0 : i32
    return %c0_i32, %c0_i32_0 : i32, i32
  }
  func.func @transform_8(%arg0: i32) -> (i32, i32) {
    %c0_i32 = arith.constant 0 : i32
    %c0_i32_0 = arith.constant 0 : i32
    %c0_i32_1 = arith.constant 0 : i32
    return %c0_i32, %c0_i32_0 : i32, i32
  }
  func.func @transform_9(%arg0: i32) -> (i32, i32) {
    %c0_i32 = arith.constant 0 : i32
    %c0_i32_0 = arith.constant 0 : i32
    %c0_i32_1 = arith.constant 0 : i32
    return %c0_i32, %c0_i32_0 : i32, i32
  }
  func.func @transform_10(%arg0: i32) -> (i32, i32) {
    %c0_i32 = arith.constant 0 : i32
    %c0_i32_0 = arith.constant 0 : i32
    return %arg0, %c0_i32 : i32, i32
  }
  func.func @transform_11(%arg0: i32) -> (i32, i32) {
    %c0_i32 = arith.constant 0 : i32
    %c0_i32_0 = arith.constant 0 : i32
    return %arg0, %c0_i32 : i32, i32
  }
}

</mosaic_0001>

<bundles_post_ra>
// kernel: mpu_gating.1
= control target key start
LH: loop header
LB: loop body
LE: loop exit
PB: predicated region body
PF: predicated region fallthrough
CT: control target
= control target key end

     0   :  { %s992_s0 = inlined_call_operand.vmem [shape: f32[8,128], index: 0, kind: input, shape index: {}]   ;;  %s993_s1 = inlined_call_operand.vmem [shape: f32[8,128], index: 1, kind: input, shape index: {}]   ;;  %s994_s2 = inlined_call_operand.vmem [shape: f32[8,128], index: 2, kind: input, shape index: {}]   ;;  %s995_s3 = inlined_call_operand.vmem [shape: f32[4,128], index: 3, kind: input, shape index: {}]   ;;  %s996_s4 = inlined_call_operand.vmem [shape: f32[2,128], index: 4, kind: input, shape index: {}]   ;;  %s997_s5 = inlined_call_operand.vmem [shape: f32[128,72], index: 5, kind: input, shape index: {}]   ;;  %s998_s6 = inlined_call_operand.vmem [shape: f32[128,72], index: 6, kind: input, shape index: {}]   ;;  %s999_s7 = inlined_call_operand.vmem [shape: f32[128,72], index: 7, kind: input, shape index: {}]   ;;  %s1000_s8 = inlined_call_operand.vmem [shape: f32[1,72], index: 8, kind: input, shape index: {}]   ;;  %s1001_s9 = inlined_call_operand.vmem [shape: f32[1,2], index: 9, kind: input, shape index: {}]   ;;  %s1002_s10 = inlined_call_operand.hbm [shape: f32[8,128], index: 10, kind: output, shape index: {0}]   ;;  %s1003_s11 = inlined_call_operand.vmem [shape: f32[8,1], index: 11, kind: output, shape index: {1}]  }
   0x1   :  { %v38_v0 = vld [vmem:[%s992_s0] sm:$0xff] }
   0x2   :  { %v742_v1 = vld [vmem:[%s993_s1] sm:$0xff]  ;;  %v39_v3 = vmax.f32 %v38_v0, 0.0 }
   0x3   :  { %v42_v2 = vld [vmem:[%s994_s2] sm:$0xff] }
   0x4   :  { %86 = vadd.xlane.f32.xlu1 %v42_v2 }
   0x5   :  { %17 = vsyncpa [#allocation3], 0  ;;  %43 = vadd.xlane.f32.xlu0 %v39_v3  ;;  %v41_v4 = vmax.f32 %v742_v1, 0.0  ;;  %v141_v5 = vld [vmem:[%s998_s6 + $0x78] sm:$0xff]  ;;  %v671_v7 = vmov 0.0   ;;  %v140_v8 = vld [vmem:[%s998_s6 + $0x70] sm:$0xff]  ;;  %v63_v55 = vlaneseq }
   0x6   :  { %v125_v6 = vld [vmem:[%s997_s5 + $0x78] sm:$0xff]  ;;  %517 = vmatprep.subr.mxu0 %v671_v7  ;;  %552 = vmatprep.subr.mxu1 %v671_v7  ;;  %v124_v9 = vld [vmem:[%s997_s5 + $0x70] sm:$0xff]  ;;  %v139_v22 = vld [vmem:[%s998_s6 + $0x68] sm:$0xff]  ;;  %vm672_vm0 = vmmov 0   ;;  %vm387_vm3 = vcmask 588800   ;;  %s673_s27 = smov 127  }
   0x7   :  { %518 = vmatpush3.msra.mxu0 %v141_v5  ;;  %553 = vmatpush3.msra.mxu1 %v125_v6  ;;  %v123_v23 = vld [vmem:[%s997_s5 + $0x68] sm:$0xff]  ;;  %v138_v24 = vld [vmem:[%s998_s6 + $0x60] sm:$0xff]  ;;  %v137_v26 = vld [vmem:[%s998_s6 + $0x58] sm:$0xff]  ;;  %v894_v56 = vshrl.u32 %v63_v55, 7  ;;  %vm434_vm4 = vcmask 7168   ;;  %s675_s29 = smov [#allocation2]  }
   0x8   :  { %519 = vmatprep.subr.mxu0 %v671_v7  ;;  %554 = vmatprep.subr.mxu1 %v671_v7  ;;  %v122_v25 = vld [vmem:[%s997_s5 + $0x60] sm:$0xff]  ;;  %v121_v27 = vld [vmem:[%s997_s5 + $0x58] sm:$0xff]  ;;  %v136_v28 = vld [vmem:[%s998_s6 + $0x50] sm:$0xff]  ;;  %s450_s30 = sshll.u32 %s675_s29, 4  ;;  %s451_s30 = int_to_ptr.vmem [resolvable:$true] %s450_s30 }
   0x9   :  { %45 = vadd.xlane.f32.xlu0 %v41_v4  ;;  %520 = vmatpush3.msra.mxu0 %v140_v8  ;;  %v120_v29 = vld [vmem:[%s997_s5 + $0x50] sm:$0xff]  ;;  %v135_v30 = vld [vmem:[%s998_s6 + $0x48] sm:$0xff]  ;;  %v134_v32 = vld [vmem:[%s998_s6 + $0x40] sm:$0xff]  ;;  %v77_v57 = vsub.s32 1, %v894_v56  ;;  %v65_v58 = vsub.s32 0, %v894_v56  ;;  %v82_v60 = vsub.s32 3, %v894_v56  ;;  %p654_p1 = scmp.lt.s32.totalorder %s451_s30, %s451_s30 }
   0xa   :  { %555 = vmatpush3.msra.mxu1 %v124_v9  ;;  %521 = vmatprep.subr.mxu0 %v671_v7  ;;  %v119_v31 = vld [vmem:[%s997_s5 + $0x48] sm:$0xff]  ;;  %v118_v33 = vld [vmem:[%s997_s5 + $0x40] sm:$0xff]  ;;  %v133_v34 = vld [vmem:[%s998_s6 + $0x38] sm:$0xff]  ;;  %v70_v61 = vsub.s32 2, %v894_v56  ;;  %s649_s12 = scalar_lea.vmem %s451_s30, 128 }
   0xb   :  { %556 = vmatprep.subr.mxu1 %v671_v7  ;;  %522 = vmatpush3.msra.mxu0 %v139_v22  ;;  %v117_v35 = vld [vmem:[%s997_s5 + $0x38] sm:$0xff]  ;;  %v132_v36 = vld [vmem:[%s998_s6 + $0x30] sm:$0xff]  ;;  %v131_v38 = vld [vmem:[%s998_s6 + $0x28] sm:$0xff]  ;;  %p650_p0 = scmp.ne.s32.totalorder %s451_s30, %s649_s12  ;;  %p655_p2 = scmp.lt.s32.totalorder %s649_s12, %s649_s12 }
   0xc   :  { %523 = vmatprep.subr.mxu0 %v671_v7  ;;  %557 = vmatpush3.msra.mxu1 %v123_v23  ;;  %v116_v37 = vld [vmem:[%s997_s5 + $0x30] sm:$0xff]  ;;  %v115_v39 = vld [vmem:[%s997_s5 + $0x28] sm:$0xff]  ;;  %v130_v40 = vld [vmem:[%s998_s6 + $0x20] sm:$0xff] }
   0xd   :  { %524 = vmatpush3.msra.mxu0 %v138_v24  ;;  %558 = vmatprep.subr.mxu1 %v671_v7  ;;  %v114_v41 = vld [vmem:[%s997_s5 + $0x20] sm:$0xff]  ;;  %v129_v42 = vld [vmem:[%s998_s6 + $0x18] sm:$0xff]  ;;  %v128_v44 = vld [vmem:[%s998_s6 + $0x10] sm:$0xff]  ;;  %p656_p3 = por %p655_p2, %p654_p1 }
   0xe   :  { %525 = vmatprep.subr.mxu0 %v671_v7  ;;  %559 = vmatpush3.msra.mxu1 %v122_v25  ;;  %v113_v43 = vld [vmem:[%s997_s5 + $0x18] sm:$0xff]  ;;  %v112_v45 = vld [vmem:[%s997_s5 + $0x10] sm:$0xff]  ;;  %v127_v46 = vld [vmem:[%s998_s6 + $0x8] sm:$0xff] }
   0xf   :  { %526 = vmatpush3.msra.mxu0 %v137_v26  ;;  %560 = vmatprep.subr.mxu1 %v671_v7  ;;  %v111_v47 = vld [vmem:[%s997_s5 + $0x8] sm:$0xff]  ;;  %v126_v48 = vld [vmem:[%s998_s6] sm:$0xff]  ;;  %v292_v22 = vld [vmem:[%s999_s7 + $0x50] sm:$0xff]  ;;  %p657_p4 = pnand %p656_p3, %p650_p0 }
  0x10   :  { %527 = vmatprep.subr.mxu0 %v671_v7  ;;  %561 = vmatpush3.msra.mxu1 %v121_v27  ;;  %v110_v49 = vld [vmem:[%s997_s5] sm:$0xff]  ;;  %v291_v23 = vld [vmem:[%s999_s7 + $0x48] sm:$0xff]  ;;  %v289_v25 = vld [vmem:[%s999_s7 + $0x38] sm:$0xff] }
  0x11   :  { %528 = vmatpush3.msra.mxu0 %v136_v28  ;;  %562 = vmatprep.subr.mxu1 %v671_v7  ;;  %v61_v59 = vld [vmem:[%s995_s3] sm:$0xf]  ;;  %v288_v28 = vld [vmem:[%s999_s7 + $0x30] sm:$0xff] }
  0x12   :  { %529 = vmatprep.subr.mxu0 %v671_v7  ;;  %563 = vmatpush3.msra.mxu1 %v120_v29  ;;  %v78_v62 = vrot.slane %v61_v59, %v77_v57  ;;  %v66_v63 = vrot.slane %v61_v59, %v65_v58  ;;  %v71_v6 = vrot.slane %v61_v59, %v70_v61  ;;  %v290_v24 = vld [vmem:[%s999_s7 + $0x40] sm:$0xff]  ;;  %v287_v29 = vld [vmem:[%s999_s7 + $0x28] sm:$0xff] }
  0x13   :  { %530 = vmatpush3.msra.mxu0 %v135_v30  ;;  %564 = vmatprep.subr.mxu1 %v671_v7  ;;  %v95_v27 = vld [vmem:[%s996_s4] sm:$0x3] }
  0x14   :  { %531 = vmatprep.subr.mxu0 %v671_v7  ;;  %565 = vmatpush3.msra.mxu1 %v119_v31  ;;  %v102_v31 = vrot.slane %v95_v27, %v65_v58 }
  0x15   :  { %532 = vmatpush3.msra.mxu0 %v134_v32  ;;  %566 = vmatprep.subr.mxu1 %v671_v7  ;;  %v286_v32 = vld [vmem:[%s999_s7 + $0x20] sm:$0xff] }
  0x16   :  { %533 = vmatprep.subr.mxu0 %v671_v7  ;;  %567 = vmatpush3.msra.mxu1 %v118_v33  ;;  %v285_v33 = vld [vmem:[%s999_s7 + $0x18] sm:$0xff] }
  0x17   :  { %534 = vmatpush3.msra.mxu0 %v133_v34  ;;  %568 = vmatprep.subr.mxu1 %v671_v7 }
  0x18   :  { %535 = vmatprep.subr.mxu0 %v671_v7  ;;  %569 = vmatpush3.msra.mxu1 %v117_v35  ;;  %v107_v35 = vrot.slane %v95_v27, %v77_v57 }
  0x19   :  { %536 = vmatpush3.msra.mxu0 %v132_v36  ;;  %570 = vmatprep.subr.mxu1 %v671_v7  ;;  %v283_v36 = vld [vmem:[%s999_s7 + $0x8] sm:$0xff] }
  0x1a   :  { %537 = vmatprep.subr.mxu0 %v671_v7  ;;  %571 = vmatpush3.msra.mxu1 %v116_v37 }
  0x1b   :  { %538 = vmatpush3.msra.mxu0 %v131_v38  ;;  %572 = vmatprep.subr.mxu1 %v671_v7  ;;  %v282_v38 = vld [vmem:[%s999_s7] sm:$0xff] }
  0x1c   :  { %539 = vmatprep.subr.mxu0 %v671_v7  ;;  %573 = vmatpush3.msra.mxu1 %v115_v39 }
  0x1d   :  { %540 = vmatpush3.msra.mxu0 %v130_v40  ;;  %574 = vmatprep.subr.mxu1 %v671_v7 }
  0x1e   :  { %541 = vmatprep.subr.mxu0 %v671_v7  ;;  %575 = vmatpush3.msra.mxu1 %v114_v41 }
  0x1f   :  { %542 = vmatpush3.msra.mxu0 %v129_v42  ;;  %576 = vmatprep.subr.mxu1 %v671_v7 }
  0x20   :  { %543 = vmatprep.subr.mxu0 %v671_v7  ;;  %577 = vmatpush3.msra.mxu1 %v113_v43 }
  0x21   :  { %544 = vmatpush3.msra.mxu0 %v128_v44  ;;  %578 = vmatprep.subr.mxu1 %v671_v7 }
  0x22   :  { %545 = vmatprep.subr.mxu0 %v671_v7  ;;  %579 = vmatpush3.msra.mxu1 %v112_v45 }
  0x23   :  { %546 = vmatpush3.msra.mxu0 %v127_v46  ;;  %580 = vmatprep.subr.mxu1 %v671_v7  ;;  %v462_v46 = vld [vmem:[%s1000_s8] ss:$0 sm:$0xff] }
  0x24   :  { %547 = vmatprep.subr.mxu0 %v671_v7  ;;  %581 = vmatpush3.msra.mxu1 %v111_v47 }
  0x25   :  { %548 = vmatpush3.msra.mxu0 %v126_v48  ;;  %582 = vmatprep.subr.mxu1 %v671_v7 }
  0x26   :  { %549 = vmatprep.mubr.msk.f32.mxu0 %vm672_vm0, %v671_v7  ;;  %583 = vmatpush3.msra.mxu1 %v110_v49 }
  0x27   :  { %584 = vmatprep.mubr.msk.f32.mxu1 %vm672_vm0, %v671_v7  ;;  %587 = vmatprep.subr.mxu0 %v671_v7 }
  0x8d   :  { %v87_v11 = vpop.xlane.xlu1 %86 }
  0x8e   :  { %v44_v10 = vpop.xlane.xlu0 %43  ;;  %v89_v14 = vmul.f32 0.0078125, %v87_v11 }
  0x90   :  { %v770_v18 = vsub.f32 %v42_v2, %v89_v14 }
  0x92   :  { %v46_v12 = vpop.xlane.xlu0 %45  ;;  %v91_v21 = vmul.f32 %v770_v18, %v770_v18 }
  0x93   :  { %v47_v13 = vadd.f32 %v46_v12, %v44_v10 }
  0x95   :  { %v48_v15 = vmul.f32 0.00390625, %v47_v13 }
  0x97   :  { %v766_v16 = vsub.f32 %v39_v3, %v48_v15  ;;  %v768_v17 = vsub.f32 %v41_v4, %v48_v15  ;;  %v83_v4 = vrot.slane %v61_v59, %v82_v60 }
  0x99   :  { %v54_v19 = vmul.f32 %v768_v17, %v768_v17  ;;  %v51_v20 = vmul.f32 %v766_v16, %v766_v16 }
  0x9b   :  { %55 = vadd.xlane.f32.xlu0 %v54_v19  ;;  %52 = vadd.xlane.f32.xlu1 %v51_v20  ;;  %v297_v19 = vld [vmem:[%s999_s7 + $0x78] sm:$0xff]  ;;  %v294_v20 = vld [vmem:[%s999_s7 + $0x60] sm:$0xff] }
  0x9f   :  { %92 = vadd.xlane.f32.xlu1 %v91_v21  ;;  %v293_v21 = vld [vmem:[%s999_s7 + $0x58] sm:$0xff] }
 0x124   :  { %v56_v50 = vpop.xlane.xlu0 %55  ;;  %v53_v51 = vpop.xlane.xlu1 %52 }
 0x125   :  { %v57_v52 = vadd.f32 %v56_v50, %v53_v51 }
 0x127   :  { %v58_v53 = vmul.f32 0.00390625, %v57_v52  ;;  %v384_v52 = vand.u32 127, %v63_v55 }
 0x128   :  { %v93_v2 = vpop.xlane.xlu1 %92 }
 0x129   :  { %v59_v54 = vadd.f32 1e-05, %v58_v53  ;;  %v94_v8 = vmul.f32 0.0078125, %v93_v2  ;;  %vm392_vm1 = vcmp.ge.s32.totalorder %v384_v52, 64  ;;  %vm385_vm2 = vcmp.lt.s32.totalorder %v384_v52, 64 }
 0x12b   :  { %629 = vrsqrt.f32 %v59_v54  ;;  %v96_v13 = vadd.f32 1e-05, %v94_v8  ;;  %v674_v8 = vmov 0  }
 0x12c   :  { %627 = vset.pattern.permute.xlu1 %v674_v8  ;;  %628 = vset.pattern.permute.xlu0 %v674_v8 }
 0x12d   :  { %631 = vrsqrt.f32 %v96_v13 }
 0x138   :  { %v630_v0 = vpop.eup %629 }
 0x139   :  { %v74_v3 = vmul.f32 %v630_v0, %v768_v17  ;;  %v62_v5 = vmul.f32 %v630_v0, %v766_v16  ;;  %v296_v17 = vld [vmem:[%s999_s7 + $0x70] sm:$0xff]  ;;  %v295_v16 = vld [vmem:[%s999_s7 + $0x68] sm:$0xff] }
 0x13a   :  { %v632_v26 = vpop.eup %631 }
 0x13b   :  { %v79_v9 = vmul.f32 %v78_v62, %v74_v3  ;;  %v67_v10 = vmul.f32 %v66_v63, %v62_v5  ;;  %v98_v30 = vmul.f32 %v632_v26, %v770_v18  ;;  %v284_v18 = vld [vmem:[%s999_s7 + $0x10] sm:$0xff] }
 0x13d   :  { %v84_v11 = vadd.f32 %v83_v4, %v79_v9  ;;  %v72_v12 = vadd.f32 %v71_v6, %v67_v10  ;;  %v103_v34 = vmul.f32 %v102_v31, %v98_v30  ;;  %v464_v4 = vld [vmem:[%s1001_s9] ss:$0 sm:$0xff] }
 0x13f   :  { %v85_v14 = vmax.f32 %v84_v11, 0.0  ;;  %v73_v15 = vmax.f32 %v72_v12, 0.0  ;;  %v108_v37 = vadd.f32 %v107_v35, %v103_v34 }
 0x141   :  { %550 = vmatmul.mubr.f32.vlgmr.msra.gmra.mxu0 %v85_v14  ;;  %585 = vmatmul.mubr.f32.vlgmr.msra.gmra.mxu1 %v73_v15  ;;  %v109_v39 = vmax.f32 %v108_v37, 0.0 }
 0x142   :  { %588 = vmatpush3.msra.mxu0 %v297_v19  ;;  %619 = vmatprep.mubr.msk.f32.mxu0 %vm672_vm0, %v671_v7 }
 0x143   :  { %589 = vmatprep.subr.mxu0 %v671_v7 }
 0x144   :  { %590 = vmatpush3.msra.mxu0 %v296_v17 }
 0x145   :  { %591 = vmatprep.subr.mxu0 %v671_v7 }
 0x146   :  { %592 = vmatpush3.msra.mxu0 %v295_v16 }
 0x147   :  { %593 = vmatprep.subr.mxu0 %v671_v7 }
 0x148   :  { %594 = vmatpush3.msra.mxu0 %v294_v20 }
 0x149   :  { %595 = vmatprep.subr.mxu0 %v671_v7 }
 0x14a   :  { %596 = vmatpush3.msra.mxu0 %v293_v21 }
 0x14b   :  { %597 = vmatprep.subr.mxu0 %v671_v7 }
 0x14c   :  { %598 = vmatpush3.msra.mxu0 %v292_v22 }
 0x14d   :  { %599 = vmatprep.subr.mxu0 %v671_v7 }
 0x14e   :  { %600 = vmatpush3.msra.mxu0 %v291_v23 }
 0x14f   :  { %601 = vmatprep.subr.mxu0 %v671_v7 }
 0x150   :  { %602 = vmatpush3.msra.mxu0 %v290_v24 }
 0x151   :  { %603 = vmatprep.subr.mxu0 %v671_v7 }
 0x152   :  { %604 = vmatpush3.msra.mxu0 %v289_v25 }
 0x153   :  { %605 = vmatprep.subr.mxu0 %v671_v7 }
 0x154   :  { %606 = vmatpush3.msra.mxu0 %v288_v28 }
 0x155   :  { %607 = vmatprep.subr.mxu0 %v671_v7 }
 0x156   :  { %608 = vmatpush3.msra.mxu0 %v287_v29 }
 0x157   :  { %609 = vmatprep.subr.mxu0 %v671_v7 }
 0x158   :  { %610 = vmatpush3.msra.mxu0 %v286_v32 }
 0x159   :  { %611 = vmatprep.subr.mxu0 %v671_v7 }
 0x15a   :  { %612 = vmatpush3.msra.mxu0 %v285_v33 }
 0x15b   :  { %613 = vmatprep.subr.mxu0 %v671_v7 }
 0x15c   :  { %614 = vmatpush3.msra.mxu0 %v284_v18 }
 0x15d   :  { %615 = vmatprep.subr.mxu0 %v671_v7 }
 0x15e   :  { %616 = vmatpush3.msra.mxu0 %v283_v36 }
 0x15f   :  { %617 = vmatprep.subr.mxu0 %v671_v7 }
 0x160   :  { %618 = vmatpush3.msra.mxu0 %v282_v38 }
 0x161   :  { %620 = vmatmul.mubr.f32.vlgmr.msra.gmra.mxu0 %v109_v39 }
 0x201   :  { %v208_v40 = vpop.f32.mrf.mxu0  ;;  %v278_v41 = vpop.f32.mrf.mxu1 }
 0x202   :  { %v279_v44 = vadd.f32 %v278_v41, %v208_v40 }
 0x203   :  { %v551_v42 = vpop.f32.mrf.mxu0  ;;  %v586_v43 = vpop.f32.mrf.mxu1 }
 0x221   :  { %v364_v45 = vpop.f32.mrf.mxu0 }
 0x222   :  { %v368_v47 = vadd.f32 %v364_v45, %v279_v44 }
 0x223   :  { %v621_v48 = vpop.f32.mrf.mxu0 }
 0x224   :  { %v376_v49 = vadd.f32 %v462_v46, %v368_v47 }
 0x226   :  { %v463_v50 = vmul.f32 -1.442695, %v376_v49 }
 0x228   :  { %633 = vpow2.f32 %v463_v50 }
 0x235   :  { %v634_v51 = vpop.eup %633 }
 0x236   :  { %v380_v7 = vadd.f32 1.0, %v634_v51 }
 0x238   :  { %635 = vrcp.f32 %v380_v7 }
 0x245   :  { %v636_v53 = vpop.eup %635 }
 0x246   :  { %v393_v54 = vsel %vm392_vm1, %v636_v53, 0.0  ;;  %v386_v56 = vsel %vm385_vm2, %v636_v53, 0.0 }
 0x247   :  { %v394_v57 = vsel %vm387_vm3, %v393_v54, 0.0  ;;  %v388_v58 = vsel %vm387_vm3, %v386_v56, 0.0 }
 0x248   :  { %395 = vadd.xlane.f32.xlu0 %v394_v57  ;;  %389 = vadd.xlane.f32.xlu1 %v388_v58 }
 0x2d1   :  { %v396_v59 = vpop.xlane.xlu0 %395  ;;  %v390_v9 = vpop.xlane.xlu1 %389 }
 0x2d2   :  { %v397_v60 = vmul.f32 0.125, %v396_v59  ;;  %v391_v10 = vmul.f32 0.015625, %v390_v9 }
 0x2d4   :  { %v414_v61 = vmax.f32 %v397_v60, 0.001  ;;  %v399_v11 = vmax.f32 %v391_v10, 0.001 }
 0x2d6   :  { %v415_v62 = vmin.f32 %v414_v61, 0.999  ;;  %v400_v12 = vmin.f32 %v399_v11, 0.999 }
 0x2d8   :  { %637 = vlog2.f32 %v415_v62  ;;  %v418_v63 = vsub.f32 1.0, %v415_v62  ;;  %v403_v13 = vsub.f32 1.0, %v400_v12 }
 0x2da   :  { %639 = vlog2.f32 %v418_v63 }
 0x2db   :  { %641 = vlog2.f32 %v403_v13 }
 0x2dc   :  { %643 = vlog2.f32 %v400_v12 }
 0x2e5   :  { %v638_v0 = vpop.eup %637 }
 0x2e6   :  { %v417_v55 = vmul.f32 0.6931472, %v638_v0 }
 0x2e7   :  { %v640_v2 = vpop.eup %639 }
 0x2e8   :  { %v420_v3 = vmul.f32 0.6931472, %v640_v2  ;;  %v642_v14 = vpop.eup %641 }
 0x2e9   :  { %v644_v15 = vpop.eup %643  ;;  %v405_v19 = vmul.f32 0.6931472, %v642_v14 }
 0x2ea   :  { %v421_v5 = vsub.f32 %v417_v55, %v420_v3  ;;  %v402_v17 = vmul.f32 0.6931472, %v644_v15 }
 0x2ec   :  { %v422_v6 = vmul.f32 %v464_v4, %v421_v5  ;;  %v406_v16 = vsub.f32 %v402_v17, %v405_v19 }
 0x2ee   :  { %424 = vrot.lane.b32.xlu0 %v422_v6, %s673_s27  ;;  %v413_v20 = vmul.f32 %v464_v4, %v406_v16 }
 0x360   :  { %v425_v21 = vpop.permute.xlu0 %424 }
 0x361   :  { %v427_v22 = vadd.f32 %v425_v21, %v413_v20 }
 0x363   :  { %v465_v23 = vmul.f32 -1.442695, %v427_v22 }
 0x365   :  { %645 = vpow2.f32 %v465_v23 }
 0x372   :  { %v646_v24 = vpop.eup %645 }
 0x373   :  { %v431_v25 = vadd.f32 1.0, %v646_v24 }
 0x375   :  { %647 = vrcp.f32 %v431_v25 }
 0x382   :  { %v648_v26 = vpop.eup %647 }
 0x383   :  { %435 = vst.msk [vmem:[%s1003_s11] sm:$0xff] %vm434_vm4, %v648_v26  ;;  %439 = vperm.xlu1 %627, %v648_v26  }
 0x3fe   :  { %v440_v27 = vpop.permute.xlu1 %439 }
 0x3ff   :  { %v442_v28 = vmul.f32 %v440_v27, %v742_v1 }
 0x401   :  { %443 = vst [vmem:[#allocation2] sm:$0xff] %v442_v28 }
 0x402   :  { %660 = shalt.err (!%p657_p4)
}
 0x403   :  { %453 = dma.vmem_to_hbm [thread:$0]  %s451_s30, 128, %s1002_s10, [#allocation3]  }
 0x404   :  { %669 = dma.done.wait [#allocation3], 128  }
 0x405   :  { %670 = vsyncadd [#allocation3], 4294967168 }
 0x406   :  { %461 = vsyncpa [#allocation3], 1 }

</bundles_post_ra>
